<compile_context>
chip_gen: v7x
topology: tpu7x:2x2x1
jax: 0.10.0
libtpu: 0.0.40
codegen_flags: <defaults>
</compile_context>

<pallas_src>
import functools

import jax
import jax.numpy as jnp
from jax.experimental import pallas as pl
from jax.experimental.pallas import tpu as pltpu

LANE = 128


def _round_up(a, b):
    return (a + b - 1) // b * b


# ---------------------------------------------------------------------------
# Kernel A: fused weight fully resident in VMEM (small / medium C).
# ---------------------------------------------------------------------------
def highway_kernel_resident(x_ref, wcat_ref, bcat_ref, o_ref):
    c = o_ref.shape[-1]                      # padded channel count (multiple of 128)
    x = x_ref[...]                           # native dtype straight into the MXU

    # One fused matmul: [rt, Cp] @ [Cp, 2*Cp] -> [rt, 2*Cp] with f32 accumulation.
    acc = jnp.dot(x, wcat_ref[...], preferred_element_type=jnp.float32)
    acc = acc + bcat_ref[...].astype(jnp.float32)

    h = jnp.maximum(acc[:, :c], 0.0)         # H = relu(x @ W1 + b1)
    t = jax.nn.sigmoid(acc[:, c:])           # T = sigmoid(x @ W2 + b2)

    xf = x.astype(jnp.float32)
    o_ref[...] = (h * t + xf * (1.0 - t)).astype(o_ref.dtype)


# ---------------------------------------------------------------------------
# Kernel B: output-channel tiled (large C).  The weight slab for column tile j
# is [W1_j | W2_j] (width 2*tn).  x_ref carries the full-width rows for the
# matmul contraction; xs_ref carries the matching column slice for the
# residual blend (avoids any dynamic lane slicing).
# ---------------------------------------------------------------------------
def highway_kernel_coltiled(x_ref, xs_ref, w_ref, b_ref, o_ref):
    tn = o_ref.shape[-1]
    acc = jnp.dot(x_ref[...], w_ref[...], preferred_element_type=jnp.float32)
    acc = acc + b_ref[...].astype(jnp.float32)

    h = jnp.maximum(acc[:, :tn], 0.0)
    t = jax.nn.sigmoid(acc[:, tn:])

    xf = xs_ref[...].astype(jnp.float32)
    o_ref[...] = (h * t + xf * (1.0 - t)).astype(o_ref.dtype)


@functools.partial(jax.jit, static_argnames=("row_tile", "weight_budget_bytes"))
def highway_forward(x, w1, b1, w2, b2, *, row_tile=None,
                    weight_budget_bytes=16 * 1024 * 1024):
    """x: [N, T, C]; w*: [C, C] (pre-transposed to C_in x C_out); b*: [C]."""
    N, T, C = x.shape
    rows = N * T

    Cp = _round_up(C, LANE)
    pad_c = Cp - C

    x_bytes = x.dtype.itemsize
    w_bytes = w1.dtype.itemsize

    # --- adaptive row tile: target ~2 MiB x blocks; shrink for tiny inputs ---
    if row_tile is None:
        rt = ((2 << 20) // max(1, Cp * x_bytes)) // 256 * 256
        row_tile = int(min(2048, max(256, rt)))
    row_tile = int(min(row_tile, _round_up(rows, 8)))
    rows_p = _round_up(rows, row_tile)
    pad_r = rows_p - rows
    n_rt = rows_p // row_tile

    # --- wrapper-side layout prep (pad rows/channels) ---
    x2d = x.reshape(rows, C)
    if pad_c or pad_r:
        x2d = jnp.pad(x2d, ((0, pad_r), (0, pad_c)))
    w1p = jnp.pad(w1, ((0, pad_c), (0, pad_c))) if pad_c else w1
    w2p = jnp.pad(w2, ((0, pad_c), (0, pad_c))) if pad_c else w2
    b1p = jnp.pad(b1, ((0, pad_c),)) if pad_c else b1
    b2p = jnp.pad(b2, ((0, pad_c),)) if pad_c else b2

    fused_w_bytes = Cp * (2 * Cp) * w_bytes

    if fused_w_bytes <= weight_budget_bytes:
        # ---------------- Path A: resident fused weight, 1-D grid ------------
        wcat = jnp.concatenate([w1p, w2p], axis=1)                    # [Cp, 2*Cp]
        bcat = jnp.concatenate([b1p, b2p], axis=0).reshape(1, 2 * Cp)

        vmem_need = (2 * row_tile * Cp * x_bytes        # x tiles (double-buffered)
                     + 2 * row_tile * Cp * x_bytes      # out tiles
                     + fused_w_bytes + 2 * Cp * w_bytes)  # resident W + b
        cost = pl.CostEstimate(
            flops=2 * rows_p * Cp * (2 * Cp) + 6 * rows_p * Cp,
            transcendentals=rows_p * Cp,
            bytes_accessed=2 * rows_p * Cp * x_bytes + fused_w_bytes + 2 * Cp * w_bytes,
        )
        out2d = pl.pallas_call(
            highway_kernel_resident,
            out_shape=jax.ShapeDtypeStruct((rows_p, Cp), x.dtype),
            grid_spec=pltpu.PrefetchScalarGridSpec(
                num_scalar_prefetch=0,
                grid=(n_rt,),
                in_specs=[
                    pl.BlockSpec((row_tile, Cp), lambda i: (i, 0)),              # x rows
                    pl.BlockSpec((Cp, 2 * Cp), lambda i: (0, 0),
                                 pipeline_mode=pl.Buffered(1)),                  # fused W
                    pl.BlockSpec((1, 2 * Cp), lambda i: (0, 0),
                                 pipeline_mode=pl.Buffered(1)),                  # fused b
                ],
                out_specs=pl.BlockSpec((row_tile, Cp), lambda i: (i, 0)),
            ),
            compiler_params=pltpu.CompilerParams(
                dimension_semantics=("parallel",),
                vmem_limit_bytes=int(min(max(2 * vmem_need, 32 << 20), 64 << 20)),
            ),
            cost_estimate=cost,
        )(x2d, wcat, bcat)
    else:
        # ---------------- Path B: tile the output-channel dimension ----------
        # per-step weight slab [Cp, 2*tn] (double-buffered) kept under budget
        tn = max(LANE, (weight_budget_bytes // (2 * Cp * 2 * w_bytes)) // LANE * LANE)
        tn = min(tn, Cp)
        while Cp % tn:
            tn -= LANE
        n_ct = Cp // tn

        # interleave column groups: slab j = [W1[:, j*tn:(j+1)*tn] | W2[:, j*tn:(j+1)*tn]]
        w1r = w1p.reshape(Cp, n_ct, tn)
        w2r = w2p.reshape(Cp, n_ct, tn)
        wcat = jnp.concatenate([w1r, w2r], axis=2).reshape(Cp, n_ct * 2 * tn)
        bcat = jnp.concatenate([b1p.reshape(n_ct, tn), b2p.reshape(n_ct, tn)],
                               axis=1).reshape(1, n_ct * 2 * tn)

        vmem_need = (2 * row_tile * Cp * x_bytes        # x (full width) tiles
                     + 2 * row_tile * tn * x_bytes      # x column-slice tiles
                     + 2 * row_tile * tn * x_bytes      # out tiles
                     + 2 * Cp * 2 * tn * w_bytes        # weight slabs
                     + 2 * 2 * tn * w_bytes)            # bias slabs
        cost = pl.CostEstimate(
            flops=2 * rows_p * Cp * (2 * Cp) + 6 * rows_p * Cp,
            transcendentals=rows_p * Cp,
            bytes_accessed=((2 + n_ct) * rows_p * Cp * x_bytes
                            + 2 * Cp * Cp * w_bytes + 2 * Cp * w_bytes),
        )
        out2d = pl.pallas_call(
            highway_kernel_coltiled,
            out_shape=jax.ShapeDtypeStruct((rows_p, Cp), x.dtype),
            grid_spec=pltpu.PrefetchScalarGridSpec(
                num_scalar_prefetch=0,
                # column tiles OUTERMOST so each weight slab stays resident
                # across the inner sweep over row tiles.
                grid=(n_ct, n_rt),
                in_specs=[
                    pl.BlockSpec((row_tile, Cp), lambda j, i: (i, 0)),   # x (matmul)
                    pl.BlockSpec((row_tile, tn), lambda j, i: (i, j)),   # x slice (residual)
                    pl.BlockSpec((Cp, 2 * tn), lambda j, i: (0, j)),     # [W1_j | W2_j]
                    pl.BlockSpec((1, 2 * tn), lambda j, i: (0, j)),      # [b1_j | b2_j]
                ],
                out_specs=pl.BlockSpec((row_tile, tn), lambda j, i: (i, j)),
            ),
            compiler_params=pltpu.CompilerParams(
                dimension_semantics=("parallel", "arbitrary"),
                vmem_limit_bytes=int(min(max(2 * vmem_need, 32 << 20), 64 << 20)),
            ),
            cost_estimate=cost,
        )(x2d, x2d, wcat, bcat)

    return out2d[:rows, :C].reshape(N, T, C)


def init_params(key, in_features, out_features):
    """Deterministic init mimicking nn.Linear defaults (uniform +-1/sqrt(in))."""
    k1, k2, k3, k4 = jax.random.split(key, 4)
    bound = 1.0 / (in_features ** 0.5)
    # Stored pre-transposed: (in_features, out_features) so the kernel does x @ W.
    w1 = jax.random.uniform(k1, (in_features, out_features), jnp.float32, -bound, bound)
    b1 = jax.random.uniform(k2, (out_features,), jnp.float32, -bound, bound)
    w2 = jax.random.uniform(k3, (in_features, out_features), jnp.float32, -bound, bound)
    b2 = jax.random.uniform(k4, (out_features,), jnp.float32, -bound, bound)
    return w1, b1, w2, b2


def highway_reference(x, w1, b1, w2, b2):
    h = jax.nn.relu(x @ w1 + b1)
    t = jax.nn.sigmoid(x @ w2 + b2)
    return h * t + x * (1.0 - t)


if __name__ == "__main__":
    key = jax.random.PRNGKey(0)

    # ---- Test 1: small shapes, resident-weight path (Path A) ----
    N, T, C = 2, 8, 32
    kx, kp, kx2, kp2 = jax.random.split(key, 4)
    x = jax.random.normal(kx, (N, T, C), jnp.float32)
    w1, b1, w2, b2 = init_params(kp, C, C)

    out = jax.block_until_ready(highway_forward(x, w1, b1, w2, b2))
    ref = highway_reference(x, w1, b1, w2, b2)
    assert out.shape == (N, T, C)
    assert jnp.allclose(out, ref, atol=1e-5, rtol=1e-5), "Path A mismatch vs reference"

    # ---- Test 2: force the output-channel-tiled path (Path B) ----
    N2, T2, C2 = 2, 16, 256
    x2 = jax.random.normal(kx2, (N2, T2, C2), jnp.float32)
    p2 = init_params(kp2, C2, C2)

    out2 = jax.block_until_ready(
        highway_forward(x2, *p2, weight_budget_bytes=256 * 1024))  # forces 2 column tiles
    ref2 = highway_reference(x2, *p2)
    assert out2.shape == (N2, T2, C2)
    assert jnp.allclose(out2, ref2, atol=1e-4, rtol=1e-4), "Path B mismatch vs reference"

    print("KERNEL_OK")
</pallas_src>

<mosaic_0001>
module attributes {stable_mosaic.version = 11 : i64} {
  func.func @highway_kernel_resident(%arg0: i32, %arg1: memref<16x128xf32, #tpu.memory_space<vmem>>, %arg2: memref<128x256xf32, #tpu.memory_space<vmem>>, %arg3: memref<1x256xf32, #tpu.memory_space<vmem>>, %arg4: memref<16x128xf32, #tpu.memory_space<vmem>>) attributes {dimension_semantics = [#tpu.dimension_semantics<parallel>], iteration_bounds = array<i64: 1>, scalar_prefetch = 0 : i64, scratch_operands = 0 : i64, tpu.core_type = #tpu.core_type<tc>, window_params = [{transform_indices = @transform_0, window_bounds = array<i64: 16, 128>}, {pipeline_mode = #tpu.pipeline_mode<synchronous>, transform_indices = @transform_1, window_bounds = array<i64: 128, 256>}, {pipeline_mode = #tpu.pipeline_mode<synchronous>, transform_indices = @transform_2, window_bounds = array<i64: 1, 256>}, {transform_indices = @transform_3, window_bounds = array<i64: 16, 128>}]} {
    %c0 = arith.constant 0 : index
    %c0_0 = arith.constant 0 : index
    %0 = vector.load %arg1[%c0, %c0_0] : memref<16x128xf32, #tpu.memory_space<vmem>>, vector<16x128xf32>
    %c0_1 = arith.constant 0 : index
    %c0_2 = arith.constant 0 : index
    %1 = vector.load %arg2[%c0_1, %c0_2] : memref<128x256xf32, #tpu.memory_space<vmem>>, vector<128x256xf32>
    %cst = arith.constant dense<0.000000e+00> : vector<16x256xf32>
    %2 = tpu.matmul %0, %1, %cst {dimension_numbers = #tpu.dot_dimension_numbers<[1], [0], [0], [1], [0, 0, 1, 1], [], []>} : vector<16x128xf32>, vector<128x256xf32>, vector<16x256xf32> -> vector<16x256xf32>
    %c0_3 = arith.constant 0 : index
    %c0_4 = arith.constant 0 : index
    %3 = vector.load %arg3[%c0_3, %c0_4] : memref<1x256xf32, #tpu.memory_space<vmem>>, vector<1x256xf32>
    %4 = vector.broadcast %3 : vector<1x256xf32> to vector<16x256xf32>
    %5 = arith.addf %2, %4 : vector<16x256xf32>
    %6 = vector.extract_strided_slice %5 {offsets = [0, 0], sizes = [16, 128], strides = [1, 1]} : vector<16x256xf32> to vector<16x128xf32>
    %cst_5 = arith.constant 0.000000e+00 : f32
    %7 = vector.broadcast %cst_5 : f32 to vector<16x128xf32>
    %8 = arith.maximumf %6, %7 : vector<16x128xf32>
    %9 = vector.extract_strided_slice %5 {offsets = [0, 128], sizes = [16, 128], strides = [1, 1]} : vector<16x256xf32> to vector<16x128xf32>
    %10 = arith.negf %9 : vector<16x128xf32>
    %11 = math.exp %10 : vector<16x128xf32>
    %cst_6 = arith.constant 1.000000e+00 : f32
    %12 = vector.broadcast %cst_6 : f32 to vector<16x128xf32>
    %13 = arith.addf %12, %11 : vector<16x128xf32>
    %14 = arith.divf %12, %13 : vector<16x128xf32>
    %15 = arith.mulf %8, %14 : vector<16x128xf32>
    %cst_7 = arith.constant 1.000000e+00 : f32
    %16 = vector.broadcast %cst_7 : f32 to vector<16x128xf32>
    %17 = arith.subf %16, %14 : vector<16x128xf32>
    %18 = arith.mulf %0, %17 : vector<16x128xf32>
    %19 = arith.addf %15, %18 : vector<16x128xf32>
    %c0_8 = arith.constant 0 : index
    %c0_9 = arith.constant 0 : index
    %20 = vector.load %arg4[%c0_8, %c0_9] : memref<16x128xf32, #tpu.memory_space<vmem>>, vector<16x128xf32>
    tpu.vector_store %arg4[%c0_8, %c0_9], %19 {strides = array<i32>} : memref<16x128xf32, #tpu.memory_space<vmem>>, vector<16x128xf32>,
    return
  }
  func.func @transform_0(%arg0: i32) -> (i32, i32) {
    %c0_i32 = arith.constant 0 : i32
    %c0_i32_0 = arith.constant 0 : i32
    return %arg0, %c0_i32 : i32, i32
  }
  func.func @transform_1(%arg0: i32) -> (i32, i32) {
    %c0_i32 = arith.constant 0 : i32
    %c0_i32_0 = arith.constant 0 : i32
    %c0_i32_1 = arith.constant 0 : i32
    return %c0_i32, %c0_i32_0 : i32, i32
  }
  func.func @transform_2(%arg0: i32) -> (i32, i32) {
    %c0_i32 = arith.constant 0 : i32
    %c0_i32_0 = arith.constant 0 : i32
    %c0_i32_1 = arith.constant 0 : i32
    return %c0_i32, %c0_i32_0 : i32, i32
  }
  func.func @transform_3(%arg0: i32) -> (i32, i32) {
    %c0_i32 = arith.constant 0 : i32
    %c0_i32_0 = arith.constant 0 : i32
    return %arg0, %c0_i32 : i32, i32
  }
}

</mosaic_0001>

<bundles_post_ra>
// kernel: highway_forward.1
= control target key start
LH: loop header
LB: loop body
LE: loop exit
PB: predicated region body
PF: predicated region fallthrough
CT: control target
= control target key end

     0   :  { %v224_v3 = vmov 0.0   ;;  %v50_v51 = vlaneseq  ;;  %s356_s1 = inlined_call_operand.vmem [shape: f32[128,256], index: 1, kind: input, shape index: {}]   ;;  %s357_s0 = inlined_call_operand.vmem [shape: f32[16,128], index: 0, kind: input, shape index: {}]   ;;  %s358_s2 = inlined_call_operand.vmem [shape: f32[1,256], index: 2, kind: input, shape index: {}]   ;;  %s359_s3 = inlined_call_operand.vmem [shape: f32[16,128], index: 3, kind: output, shape index: {}]  }
   0x1   :  { %v17_v0 = vld [vmem:[%s356_s1 + $0x8] sm:$0xff]  ;;  %v19_v1 = vld [vmem:[%s356_s1 + $0x18] sm:$0xff]  ;;  %v16_v2 = vld [vmem:[%s356_s1] sm:$0xff]  ;;  %124 = vmatprep.mubr.f32.mxu0 %v224_v3  ;;  %130 = vmatprep.mubr.f32.mxu1 %v224_v3 }
   0x2   :  { %v167_v4 = vpack.c.bf16 %v19_v1, %v17_v0  ;;  %v18_v5 = vld [vmem:[%s356_s1 + $0x10] sm:$0xff]  ;;  %v21_v6 = vld [vmem:[%s356_s1 + $0x28] sm:$0xff]  ;;  %v23_v7 = vld [vmem:[%s356_s1 + $0x38] sm:$0xff]  ;;  %v51_v52 = vshrl.u32 %v50_v51, 7 }
   0x3   :  { %v169_v8 = vpack.c.bf16 %v18_v5, %v16_v2  ;;  %v171_v9 = vpack.c.bf16 %v23_v7, %v21_v6  ;;  %v20_v10 = vld [vmem:[%s356_s1 + $0x20] sm:$0xff]  ;;  %v22_v11 = vld [vmem:[%s356_s1 + $0x30] sm:$0xff]  ;;  %v25_v12 = vld [vmem:[%s356_s1 + $0x48] sm:$0xff] }
   0x4   :  { %168 = vmatprep.subr.bf16.mxu0 %v167_v4  ;;  %199 = vmatprep.subr.bf16.mxu1 %v167_v4  ;;  %v27_v13 = vld [vmem:[%s356_s1 + $0x58] sm:$0xff]  ;;  %v173_v14 = vpack.c.bf16 %v22_v11, %v20_v10  ;;  %v24_v16 = vld [vmem:[%s356_s1 + $0x40] sm:$0xff]  ;;  %v26_v17 = vld [vmem:[%s356_s1 + $0x50] sm:$0xff]  ;;  %v56_v53 = vsub.s32 1, %v51_v52  ;;  %v52_v1 = vsub.s32 0, %v51_v52 }
   0x5   :  { %170 = vmatpush1.bf16.msra.mxu0 %v169_v8  ;;  %207 = vmatpush1.bf16.msra.mxu1 %v169_v8  ;;  %v175_v15 = vpack.c.bf16 %v27_v13, %v25_v12  ;;  %v29_v18 = vld [vmem:[%s356_s1 + $0x68] sm:$0xff]  ;;  %v31_v19 = vld [vmem:[%s356_s1 + $0x78] sm:$0xff]  ;;  %v177_v20 = vpack.c.bf16 %v26_v17, %v24_v16  ;;  %v28_v22 = vld [vmem:[%s356_s1 + $0x60] sm:$0xff] }
   0x6   :  { %172 = vmatprep.subr.bf16.mxu0 %v171_v9  ;;  %200 = vmatprep.subr.bf16.mxu1 %v171_v9  ;;  %v179_v21 = vpack.c.bf16 %v31_v19, %v29_v18  ;;  %v30_v23 = vld [vmem:[%s356_s1 + $0x70] sm:$0xff]  ;;  %v33_v24 = vld [vmem:[%s356_s1 + $0x88] sm:$0xff]  ;;  %v35_v25 = vld [vmem:[%s356_s1 + $0x98] sm:$0xff] }
   0x7   :  { %v181_v26 = vpack.c.bf16 %v30_v23, %v28_v22  ;;  %v183_v27 = vpack.c.bf16 %v35_v25, %v33_v24  ;;  %v32_v28 = vld [vmem:[%s356_s1 + $0x80] sm:$0xff]  ;;  %v34_v29 = vld [vmem:[%s356_s1 + $0x90] sm:$0xff]  ;;  %v37_v30 = vld [vmem:[%s356_s1 + $0xa8] sm:$0xff] }
   0x8   :  { %v39_v31 = vld [vmem:[%s356_s1 + $0xb8] sm:$0xff]  ;;  %v185_v32 = vpack.c.bf16 %v34_v29, %v32_v28  ;;  %v36_v34 = vld [vmem:[%s356_s1 + $0xa0] sm:$0xff]  ;;  %v38_v35 = vld [vmem:[%s356_s1 + $0xb0] sm:$0xff] }
   0x9   :  { %174 = vmatpush1.bf16.msra.mxu0 %v173_v14  ;;  %208 = vmatpush1.bf16.msra.mxu1 %v173_v14  ;;  %v187_v33 = vpack.c.bf16 %v39_v31, %v37_v30  ;;  %v41_v36 = vld [vmem:[%s356_s1 + $0xc8] sm:$0xff]  ;;  %v43_v37 = vld [vmem:[%s356_s1 + $0xd8] sm:$0xff]  ;;  %v189_v38 = vpack.c.bf16 %v38_v35, %v36_v34  ;;  %v40_v40 = vld [vmem:[%s356_s1 + $0xc0] sm:$0xff] }
   0xa   :  { %176 = vmatprep.subr.bf16.mxu0 %v175_v15  ;;  %201 = vmatprep.subr.bf16.mxu1 %v175_v15  ;;  %v191_v39 = vpack.c.bf16 %v43_v37, %v41_v36  ;;  %v42_v41 = vld [vmem:[%s356_s1 + $0xd0] sm:$0xff]  ;;  %v45_v42 = vld [vmem:[%s356_s1 + $0xe8] sm:$0xff]  ;;  %v47_v43 = vld [vmem:[%s356_s1 + $0xf8] sm:$0xff] }
   0xb   :  { %v193_v44 = vpack.c.bf16 %v42_v41, %v40_v40  ;;  %v195_v45 = vpack.c.bf16 %v47_v43, %v45_v42  ;;  %v44_v46 = vld [vmem:[%s356_s1 + $0xe0] sm:$0xff]  ;;  %v46_v47 = vld [vmem:[%s356_s1 + $0xf0] sm:$0xff]  ;;  %v15_v50 = vld [vmem:[%s357_s0 + $0x8] sm:$0xff] }
   0xc   :  { %v197_v48 = vpack.c.bf16 %v46_v47, %v44_v46  ;;  %v14_v49 = vld [vmem:[%s357_s0] sm:$0xff] }
   0xd   :  { %178 = vmatpush1.bf16.msra.mxu0 %v177_v20  ;;  %209 = vmatpush1.bf16.msra.mxu1 %v177_v20  ;;  %v48_v54 = vld [vmem:[%s358_s2] sm:$0x3] }
   0xe   :  { %180 = vmatprep.subr.bf16.mxu0 %v179_v21  ;;  %202 = vmatprep.subr.bf16.mxu1 %v179_v21  ;;  %v57_v55 = vrot.slane %v48_v54, %v56_v53  ;;  %v53_v5 = vrot.slane %v48_v54, %v52_v1 }
  0x11   :  { %182 = vmatpush1.bf16.msra.mxu0 %v181_v26  ;;  %210 = vmatpush1.bf16.msra.mxu1 %v181_v26 }
  0x12   :  { %184 = vmatprep.subr.bf16.mxu0 %v183_v27  ;;  %203 = vmatprep.subr.bf16.mxu1 %v183_v27 }
  0x15   :  { %186 = vmatpush1.bf16.msra.mxu0 %v185_v32  ;;  %211 = vmatpush1.bf16.msra.mxu1 %v185_v32 }
  0x16   :  { %188 = vmatprep.subr.bf16.mxu0 %v187_v33  ;;  %204 = vmatprep.subr.bf16.mxu1 %v187_v33 }
  0x19   :  { %190 = vmatpush1.bf16.msra.mxu0 %v189_v38  ;;  %212 = vmatpush1.bf16.msra.mxu1 %v189_v38 }
  0x1a   :  { %192 = vmatprep.subr.bf16.mxu0 %v191_v39  ;;  %205 = vmatprep.subr.bf16.mxu1 %v191_v39 }
  0x1d   :  { %194 = vmatpush1.bf16.msra.mxu0 %v193_v44  ;;  %213 = vmatpush1.bf16.msra.mxu1 %v193_v44 }
  0x1e   :  { %196 = vmatprep.subr.bf16.mxu0 %v195_v45  ;;  %206 = vmatprep.subr.bf16.mxu1 %v195_v45 }
  0x21   :  { %198 = vmatpush1.bf16.msra.mxu0 %v197_v48  ;;  %214 = vmatpush1.bf16.msra.mxu1 %v197_v48 }
  0x24   :  { %125 = vmatmul.mubr.f32.vlgmr.msra.gmra.mrb[0].mxu0 %v14_v49  ;;  %131 = vmatmul.mubr.f32.vlgmr.msra.gmra.mrb[0].mxu1 %v15_v50 }
  0xf7   :  { %v126_v56 = vpop.f32.mrb[0].mxu0  ;;  %v132_v57 = vpop.f32.mrb[0].mxu1 }
  0xf8   :  { %v128_v58 = vpop.f32.mrb[1].mxu0  ;;  %v134_v59 = vpop.f32.mrb[1].mxu1  ;;  %v127_v6 = vadd.f32 %v126_v56, %v53_v5  ;;  %v133_v7 = vadd.f32 %v132_v57, %v53_v5 }
  0xf9   :  { %v129_v60 = vadd.f32 %v128_v58, %v57_v55  ;;  %v135_v61 = vadd.f32 %v134_v59, %v57_v55 }
  0xfa   :  { %v137_v8 = vmax.f32 %v127_v6, 0.0  ;;  %v138_v10 = vmax.f32 %v133_v7, 0.0 }
  0xfb   :  { %v165_v62 = vmul.f32 -1.442695, %v129_v60  ;;  %v166_v63 = vmul.f32 -1.442695, %v135_v61 }
  0xfd   :  { %216 = vpow2.f32 %v165_v62 }
  0xfe   :  { %218 = vpow2.f32 %v166_v63 }
 0x107   :  { %v217_v0 = vpop.eup %216 }
 0x108   :  { %v219_v2 = vpop.eup %218  ;;  %v145_v3 = vadd.f32 1.0, %v217_v0 }
 0x109   :  { %v146_v4 = vadd.f32 1.0, %v219_v2 }
 0x10a   :  { %220 = vrcp.f32 %v145_v3 }
 0x10b   :  { %222 = vrcp.f32 %v146_v4 }
 0x114   :  { %v221_v9 = vpop.eup %220 }
 0x115   :  { %v223_v11 = vpop.eup %222  ;;  %v151_v12 = vmul.f32 %v221_v9, %v137_v8  ;;  %v153_v13 = vsub.f32 1.0, %v221_v9 }
 0x116   :  { %v152_v14 = vmul.f32 %v223_v11, %v138_v10  ;;  %v154_v15 = vsub.f32 1.0, %v223_v11 }
 0x117   :  { %v155_v16 = vmul.f32 %v153_v13, %v14_v49 }
 0x118   :  { %v156_v17 = vmul.f32 %v154_v15, %v15_v50 }
 0x119   :  { %v157_v18 = vadd.f32 %v155_v16, %v151_v12 }
 0x11a   :  { %v158_v19 = vadd.f32 %v156_v17, %v152_v14 }
 0x11b   :  { %159 = vst [vmem:[%s359_s3] sm:$0xff] %v157_v18 }
 0x11c   :  { %160 = vst [vmem:[%s359_s3 + $0x8] sm:$0xff] %v158_v19 }

</bundles_post_ra>
